<compile_context>
chip_gen: v5e
topology: v5e:2x2
jax: 0.10.0
libtpu: 0.0.40
codegen_flags: <defaults>
</compile_context>

<pallas_src>
import functools

import jax
import jax.numpy as jnp
from jax.experimental import pallas as pl
from jax.experimental.pallas import tpu as pltpu

_MIB = 1024 * 1024


# ----------------------------------------------------------------------------- kernel
def _combine_kernel(grad_ref, ua_ref, wa_ref, ub_ref, wb_ref, out_ref, *, compute_dtype):
  """out = grad * (ua*wa) + (ub*wb); rank-1 factors via VPU broadcast multiplies.

  Shapes per grid step:
    grad_ref/out_ref : (TP0, G1)   -- streamed, double-buffered
    ua_ref/ub_ref    : (TP0, 1)    -- per-row factors (sigmoid scale pre-folded in)
    wa_ref/wb_ref    : (1,  G1)    -- per-col factors
  """
  g = grad_ref[...].astype(compute_dtype)
  a_tile = ua_ref[...] * wa_ref[...]        # (TP0,1)*(1,G1) -> rank-1 "a" tile
  b_tile = ub_ref[...] * wb_ref[...]        # (TP0,1)*(1,G1) -> rank-1 "b" tile
  out_ref[...] = (g * a_tile + b_tile).astype(out_ref.dtype)


# --------------------------------------------------------------- conditioning network
def _conditioning_network(inputs, params, p0, p1, max_scale):
  """Plain-JAX hoisted MLP: weight-norm Linear -> tanh -> weight-norm Linear."""
  def wn(v, g):  # torch.nn.utils.weight_norm(dim=0): W[i,:] = g[i]*v[i,:]/||v[i,:]||
    return v * (g * jax.lax.rsqrt(jnp.sum(v * v, axis=1, keepdims=True)))

  w1 = wn(params["v1"], params["g1"])
  w2 = wn(params["v2"], params["g2"])
  h = jnp.tanh(inputs @ w1.T + params["b1"])        # (1, H)
  c = h @ w2.T + params["b2"]                       # (1, 2*(p0+p1)+1)

  # split([p1, p0, p1, p0, 1], dim=-1)
  cola = c[:, :p1]                                  # (1, p1)
  rowa = c[:, p1:p1 + p0]                           # (1, p0)
  colb = c[:, p1 + p0:2 * p1 + p0]                  # (1, p1)
  rowb = c[:, 2 * p1 + p0:2 * (p1 + p0)]            # (1, p0)
  cnorm = c[:, 2 * (p1 + p0):]                      # (1, 1)

  rowa_sm = jax.nn.softmax(rowa, axis=-1)
  rowb_sm = jax.nn.softmax(rowb, axis=-1)
  scale = max_scale * jax.nn.sigmoid(cnorm)         # (1, 1) scalar
  return cola, rowa_sm, colb, rowb_sm, scale


# -------------------------------------------------------------------- TPU gen queries
def _tpu_info():
  """(vmem_capacity_bytes, is_v5e, is_v6) with conservative fallbacks."""
  kind = ""
  try:
    kind = jax.devices()[0].device_kind.lower()
  except Exception:
    pass
  vmem_cap = None
  try:
    vmem_cap = int(pltpu.get_tpu_info().vmem_capacity_bytes)
  except Exception:
    vmem_cap = None
  if vmem_cap is None:
    if ("v4" in kind) or ("v5" in kind) or ("v6" in kind):
      vmem_cap = 128 * _MIB
    else:
      vmem_cap = 64 * _MIB            # conservative (covers v7x's 64 MiB / TC)
  is_v5e = ("v5e" in kind) or ("v5 lite" in kind) or ("v5lite" in kind)
  is_v6 = "v6" in kind
  return vmem_cap, is_v5e, is_v6


# ----------------------------------------------------------------------- tile picking
def _pick_tile_rows(g0, g1, itemsize, target_tile_bytes):
  """Rows per tile: multiple of 8, ~target bytes per buffer, and >= 2 row tiles."""
  if g0 <= 8:
    return g0
  row_bytes = max(1, g1 * itemsize)
  rows = max(8, (target_tile_bytes // row_bytes) // 8 * 8)
  # Guarantee at least 2 grid tiles: feeds both v7x TensorCores on the "parallel"
  # axis and lets grad/out double-buffering actually overlap DMA with compute.
  half = (((g0 + 1) // 2) + 7) // 8 * 8
  rows = min(rows, max(8, half))
  # Prefer an even number of grid steps (balanced 2-way TensorCore split on v7x).
  n = -(-g0 // rows)
  if n > 1 and n % 2 == 1:
    rows_even = ((-(-g0 // (n + 1))) + 7) // 8 * 8
    if rows_even >= 8 and (-(-g0 // rows_even)) % 2 == 0:
      rows = rows_even
  return rows


def _max_rows_for_cap(g1, itemsize, cap_bytes):
  """Largest multiple-of-8 row count whose full VMEM budget fits under cap_bytes."""
  per_row = 4 * g1 * itemsize + 4 * 128 * itemsize   # grad+out dbl-buf + lane-padded ua/ub dbl-buf
  fixed = 4 * 8 * g1 * itemsize + 2 * _MIB           # sublane-padded wa/wb dbl-buf + slack
  avail = cap_bytes - fixed
  if avail <= 0:
    return 0
  return max(0, (avail // per_row) // 8 * 8)


def _vmem_budget(tp0, g1, itemsize):
  return (4 * tp0 * g1 * itemsize          # grad + out tiles, double-buffered
          + 4 * tp0 * 128 * itemsize       # ua + ub (tp0,1) lane-padded, double-buffered
          + 4 * 8 * g1 * itemsize          # wa + wb (1,g1) sublane-padded, double-buffered
          + 2 * _MIB)                      # slack for compiler internals


# -------------------------------------------------------------------- plain-JAX paths
def _combine_jax(grad, ua, wa, ub, wb):
  g = grad.astype(jnp.float32)
  out = g * (ua.astype(jnp.float32) * wa.astype(jnp.float32)) \
        + ub.astype(jnp.float32) * wb.astype(jnp.float32)
  return out.astype(grad.dtype)


# -------------------------------------------------------------------------- wrapper
def conditioned_parameter_forward(inputs, grad, params, *, param_shape,
                                  max_scale=1.0, tile_rows=None,
                                  donate_grad=True,
                                  small_fallback_bytes=384 * 1024):
  """Forward of ConditionedParameter for a 2-D conditioned parameter."""
  # TODO(synk): 1-D parameter branch of the module (no softmax / outer product) not implemented.
  p0, p1 = param_shape
  if inputs.shape[0] != 1:
    raise RuntimeError("Can only condition on batches of size 1")

  cola, rowa_sm, colb, rowb_sm, scale = _conditioning_network(
      inputs, params, p0, p1, float(max_scale))

  g0, g1 = grad.shape
  if (g0, g1) == (p0, p1):
    # matching-shape branch: a = softmax(rowa).T @ cola  ->  a[i,j] = rowa_sm[i]*cola[j]
    ua = (scale * rowa_sm).reshape(p0, 1)
    wa = cola                                     # (1, p1)
    ub = (scale * rowb_sm).reshape(p0, 1)
    wb = colb                                     # (1, p1)
  elif (g0, g1) == (p1, p0):
    # transposed branch: grad * a.T + b.T ; a.T[i,j] = cola[i]*rowa_sm[j]
    ua = (scale * cola).reshape(p1, 1)
    wa = rowa_sm                                  # (1, p0)
    ub = (scale * colb).reshape(p1, 1)
    wb = rowb_sm                                  # (1, p0)
  else:
    raise ValueError(f"grad shape {grad.shape} incompatible with param_shape {param_shape}")

  isz = grad.dtype.itemsize
  grad_bytes = g0 * g1 * isz

  # Small-grad fallback: fixed pallas_call launch + per-step overhead would dominate.
  if grad_bytes < small_fallback_bytes:
    return _combine_jax(grad, ua, wa, ub, wb)

  vmem_cap, is_v5e, is_v6 = _tpu_info()
  cap = int(min(vmem_cap - 16 * _MIB, 100 * _MIB))   # headroom: 48 MiB on v7x, 100 MiB on v5e/v6e

  # bf16-native VPU combine on v6e/v7x; keep f32 path on v5e (no bf16 VALU).
  if grad.dtype == jnp.bfloat16 and not is_v5e:
    compute_dtype = jnp.bfloat16
  else:
    compute_dtype = jnp.float32
  ua = ua.astype(compute_dtype)
  ub = ub.astype(compute_dtype)
  wa = wa.astype(compute_dtype)
  wb = wb.astype(compute_dtype)

  target_tile_bytes = 8 * _MIB if is_v6 else 4 * _MIB
  tp0 = tile_rows if tile_rows is not None else _pick_tile_rows(g0, g1, isz, target_tile_bytes)
  tp0 = min(int(tp0), g0)
  if tp0 != g0 and tp0 % 8 != 0:
    raise ValueError("tile_rows must be a multiple of 8 (or equal the row count)")

  # Clamp tile height so the full (padded, double-buffered) budget fits physical VMEM.
  max_rows = _max_rows_for_cap(g1, isz, cap)
  if tp0 != g0 and max_rows >= 8:
    tp0 = min(tp0, max_rows)

  budget = _vmem_budget(tp0, g1, isz)
  if budget > cap:
    # Cannot tile safely (e.g. g0 <= 8 with an enormous lane dim) -> fused JAX combine.
    return _combine_jax(grad, ua, wa, ub, wb)
  vmem_limit = int(min(cap, max(32 * _MIB, budget)))

  grid = (pl.cdiv(g0, tp0),)
  grad_spec = pl.BlockSpec((tp0, g1), lambda i: (i, 0))   # streamed row tiles
  col_spec = pl.BlockSpec((tp0, 1), lambda i: (i, 0))     # per-row factors, tiled with grad
  row_spec = pl.BlockSpec((1, g1), lambda i: (0, 0))      # per-col factors, resident

  cost = pl.CostEstimate(
      flops=4 * g0 * g1,
      transcendentals=0,
      bytes_accessed=2 * grad_bytes + 2 * (g0 + g1) * isz)

  out = pl.pallas_call(
      functools.partial(_combine_kernel, compute_dtype=compute_dtype),
      out_shape=jax.ShapeDtypeStruct((g0, g1), grad.dtype),
      grid=grid,
      in_specs=[grad_spec, col_spec, row_spec, col_spec, row_spec],
      out_specs=grad_spec,
      compiler_params=pltpu.CompilerParams(
          dimension_semantics=("parallel",),
          vmem_limit_bytes=vmem_limit),
      input_output_aliases={0: 0} if donate_grad else {},
      cost_estimate=cost,
  )(grad, ua, wa, ub, wb)
  return out


# ------------------------------------------------------------------------- reference
def _reference_forward(inputs, grad, params, *, param_shape, max_scale=1.0):
  """Pure-JAX reference mirroring the torch module (both 2-D branches)."""
  p0, p1 = param_shape
  def wn(v, g):
    return v * (g / jnp.linalg.norm(v, axis=1, keepdims=True))
  w1, w2 = wn(params["v1"], params["g1"]), wn(params["v2"], params["g2"])
  h = jnp.tanh(inputs @ w1.T + params["b1"])
  c = h @ w2.T + params["b2"]
  cola = c[:, :p1]
  rowa = c[:, p1:p1 + p0]
  colb = c[:, p1 + p0:2 * p1 + p0]
  rowb = c[:, 2 * p1 + p0:2 * (p1 + p0)]
  cnorm = c[:, -1:]
  a = jax.nn.softmax(rowa, axis=-1).T @ cola
  b = jax.nn.softmax(rowb, axis=-1).T @ colb
  scale = max_scale * jax.nn.sigmoid(cnorm)
  if grad.shape[0] != p0:
    return scale * (grad * a.T + b.T)
  return scale * (grad * a + b)


# ------------------------------------------------------------------------------ main
if __name__ == "__main__":
  condition_dim, hidden_dim = 32, 16
  p0, p1 = 256, 128                     # conditioned-parameter shape (2-D case)
  out_dim = 2 * (p0 + p1) + 1
  max_scale = 1.0

  key = jax.random.PRNGKey(0)
  k = jax.random.split(key, 8)
  inputs = jax.random.normal(k[0], (1, condition_dim), jnp.float32)
  grad = jax.random.normal(k[1], (p0, p1), jnp.float32)

  params = {
      "v1": 0.2 * jax.random.normal(k[2], (hidden_dim, condition_dim), jnp.float32),
      "g1": 1.0 + 0.1 * jax.random.normal(k[3], (hidden_dim, 1), jnp.float32),
      "b1": 0.1 * jax.random.normal(k[4], (1, hidden_dim), jnp.float32),
      "v2": 0.2 * jax.random.normal(k[5], (out_dim, hidden_dim), jnp.float32),
      "g2": 1.0 + 0.1 * jax.random.normal(k[6], (out_dim, 1), jnp.float32),
      "b2": 0.1 * jax.random.normal(k[7], (1, out_dim), jnp.float32),
  }

  ref = _reference_forward(inputs, grad, params, param_shape=(p0, p1), max_scale=max_scale)

  # 1) Matching-shape branch through the Pallas path (small_fallback_bytes=0 forces it;
  #    tile_rows=64 exercises a 4-step grid). Jitted wrapper.
  fwd = jax.jit(functools.partial(
      conditioned_parameter_forward,
      param_shape=(p0, p1), max_scale=max_scale, tile_rows=64, small_fallback_bytes=0))
  out = jax.block_until_ready(fwd(inputs, grad, params))
  assert out.shape == (p0, p1)
  assert jnp.allclose(out, ref, atol=1e-5, rtol=1e-5), "mismatch vs reference (matching branch)"

  # 2) Transposed-grad branch (grad laid out (p1, p0)): Pallas path, auto tile rows
  #    (>= 2 grid tiles guaranteed), no grad transpose.
  grad_t = jax.random.normal(jax.random.PRNGKey(1), (p1, p0), jnp.float32)
  out_t = jax.block_until_ready(conditioned_parameter_forward(
      inputs, grad_t, params, param_shape=(p0, p1), max_scale=max_scale,
      small_fallback_bytes=0))
  ref_t = _reference_forward(inputs, grad_t, params, param_shape=(p0, p1), max_scale=max_scale)
  assert out_t.shape == (p1, p0)
  assert jnp.allclose(out_t, ref_t, atol=1e-5, rtol=1e-5), "mismatch vs reference (transposed branch)"

  # 3) Default call on this small grad (128 KiB) hits the fused plain-JAX fallback.
  out_fb = jax.block_until_ready(conditioned_parameter_forward(
      inputs, grad, params, param_shape=(p0, p1), max_scale=max_scale))
  assert jnp.allclose(out_fb, ref, atol=1e-5, rtol=1e-5), "mismatch vs reference (fallback path)"

  print("KERNEL_OK")
</pallas_src>

<mosaic_0001>
module attributes {stable_mosaic.version = 11 : i64} {
  func.func @_combine_kernel(%arg0: i32, %arg1: memref<64x128xf32, #tpu.memory_space<vmem>>, %arg2: memref<64x1xf32, #tpu.memory_space<vmem>>, %arg3: memref<1x128xf32, #tpu.memory_space<vmem>>, %arg4: memref<64x1xf32, #tpu.memory_space<vmem>>, %arg5: memref<1x128xf32, #tpu.memory_space<vmem>>, %arg6: memref<64x128xf32, #tpu.memory_space<vmem>>) attributes {dimension_semantics = [#tpu.dimension_semantics<parallel>], iteration_bounds = array<i64: 4>, scalar_prefetch = 0 : i64, scratch_operands = 0 : i64, tpu.core_type = #tpu.core_type<tc>, window_params = [{transform_indices = @transform_0, window_bounds = array<i64: 64, 128>}, {transform_indices = @transform_1, window_bounds = array<i64: 64, 1>}, {pipeline_mode = #tpu.pipeline_mode<synchronous>, transform_indices = @transform_2, window_bounds = array<i64: 1, 128>}, {transform_indices = @transform_3, window_bounds = array<i64: 64, 1>}, {pipeline_mode = #tpu.pipeline_mode<synchronous>, transform_indices = @transform_4, window_bounds = array<i64: 1, 128>}, {transform_indices = @transform_5, window_bounds = array<i64: 64, 128>}]} {
    %c0 = arith.constant 0 : index
    %c0_0 = arith.constant 0 : index
    %0 = vector.load %arg1[%c0, %c0_0] : memref<64x128xf32, #tpu.memory_space<vmem>>, vector<64x128xf32>
    %c0_1 = arith.constant 0 : index
    %c0_2 = arith.constant 0 : index
    %1 = vector.load %arg2[%c0_1, %c0_2] : memref<64x1xf32, #tpu.memory_space<vmem>>, vector<64x1xf32>
    %c0_3 = arith.constant 0 : index
    %c0_4 = arith.constant 0 : index
    %2 = vector.load %arg3[%c0_3, %c0_4] : memref<1x128xf32, #tpu.memory_space<vmem>>, vector<1x128xf32>
    %3 = vector.broadcast %1 : vector<64x1xf32> to vector<64x128xf32>
    %4 = vector.broadcast %2 : vector<1x128xf32> to vector<64x128xf32>
    %5 = arith.mulf %3, %4 : vector<64x128xf32>
    %c0_5 = arith.constant 0 : index
    %c0_6 = arith.constant 0 : index
    %6 = vector.load %arg4[%c0_5, %c0_6] : memref<64x1xf32, #tpu.memory_space<vmem>>, vector<64x1xf32>
    %c0_7 = arith.constant 0 : index
    %c0_8 = arith.constant 0 : index
    %7 = vector.load %arg5[%c0_7, %c0_8] : memref<1x128xf32, #tpu.memory_space<vmem>>, vector<1x128xf32>
    %8 = vector.broadcast %6 : vector<64x1xf32> to vector<64x128xf32>
    %9 = vector.broadcast %7 : vector<1x128xf32> to vector<64x128xf32>
    %10 = arith.mulf %8, %9 : vector<64x128xf32>
    %11 = arith.mulf %0, %5 : vector<64x128xf32>
    %12 = arith.addf %11, %10 : vector<64x128xf32>
    %c0_9 = arith.constant 0 : index
    %c0_10 = arith.constant 0 : index
    %13 = vector.load %arg6[%c0_9, %c0_10] : memref<64x128xf32, #tpu.memory_space<vmem>>, vector<64x128xf32>
    tpu.vector_store %arg6[%c0_9, %c0_10], %12 {strides = array<i32>} : memref<64x128xf32, #tpu.memory_space<vmem>>, vector<64x128xf32>,
    return
  }
  func.func @transform_0(%arg0: i32) -> (i32, i32) {
    %c0_i32 = arith.constant 0 : i32
    %c0_i32_0 = arith.constant 0 : i32
    return %arg0, %c0_i32 : i32, i32
  }
  func.func @transform_1(%arg0: i32) -> (i32, i32) {
    %c0_i32 = arith.constant 0 : i32
    %c0_i32_0 = arith.constant 0 : i32
    return %arg0, %c0_i32 : i32, i32
  }
  func.func @transform_2(%arg0: i32) -> (i32, i32) {
    %c0_i32 = arith.constant 0 : i32
    %c0_i32_0 = arith.constant 0 : i32
    %c0_i32_1 = arith.constant 0 : i32
    return %c0_i32, %c0_i32_0 : i32, i32
  }
  func.func @transform_3(%arg0: i32) -> (i32, i32) {
    %c0_i32 = arith.constant 0 : i32
    %c0_i32_0 = arith.constant 0 : i32
    return %arg0, %c0_i32 : i32, i32
  }
  func.func @transform_4(%arg0: i32) -> (i32, i32) {
    %c0_i32 = arith.constant 0 : i32
    %c0_i32_0 = arith.constant 0 : i32
    %c0_i32_1 = arith.constant 0 : i32
    return %c0_i32, %c0_i32_0 : i32, i32
  }
  func.func @transform_5(%arg0: i32) -> (i32, i32) {
    %c0_i32 = arith.constant 0 : i32
    %c0_i32_0 = arith.constant 0 : i32
    return %arg0, %c0_i32 : i32, i32
  }
}

</mosaic_0001>

<bundles_post_ra>
// kernel: conditioned_parameter_forward.1
= control target key start
LH: loop header
LB: loop body
LE: loop exit
PB: predicated region body
PF: predicated region fallthrough
CT: control target
= control target key end

     0   :  { %10 = vsyncpa [#allocation3], 0  ;;  %s938_s0 = inlined_call_operand.hbm [shape: f32[256,128], index: 0, kind: input, shape index: {}, may-alias: {0,5}]   ;;  %s939_s1 = inlined_call_operand.vmem [shape: f32[256,1], index: 1, kind: input, shape index: {}]   ;;  %s940_s2 = inlined_call_operand.vmem [shape: f32[1,128], index: 2, kind: input, shape index: {}]   ;;  %s941_s3 = inlined_call_operand.vmem [shape: f32[256,1], index: 3, kind: input, shape index: {}]   ;;  %s942_s4 = inlined_call_operand.vmem [shape: f32[1,128], index: 4, kind: input, shape index: {}]   ;;  %s943_s5 = inlined_call_operand.hbm [shape: f32[256,128], index: 5, kind: output, shape index: {}, may-alias: {0,5}]  }
   0x1   :  { %12 = vsyncpa [#allocation3 + $0x1], 0 }
   0x2   :  { %13 = vsyncpa [#allocation4], 0 }
   0x3   :  { %15 = vsyncpa [#allocation4 + $0x1], 0  ;;  %s765_s18 = smov 0   ;;  %s767_s19 = smov 0  }
   0x4   :  { %s769_s20 = smov 0   ;;  %s771_s21 = smov 0  }
   0x5 LB: > { %s786_s22 = sadd.s32 4294967295, %s728_s21   ;;  %s556_s23 = sadd.s32 4294967294, %s728_s21   ;;  %s728_s21 = sphi %s771_s21, %s952_s21   ;;  %s724_s20 = sphi %s769_s20, %s951_s20   ;;  %s720_s19 = sphi %s767_s19, %s950_s19   ;;  %s716_s18 = sphi %s765_s18, %s949_s18  }
   0x6   : > { %s790_s24 = sadd.s32 1, %s728_s21   ;;  %s28_s25 = sadd.s32 1, %s724_s20 }
   0x7   : > { %s25_s26 = ssub.s32 %s728_s21, %s790_s24  ;;  %p35_p0 = scmp.ne.s32.totalorder %s724_s20, %s720_s19 }
   0x8   : > { %p26_p1 = scmp.eq.s32.totalorder %s25_s26, 0  ;;  %p36_p2 = scmp.eq.s32.totalorder %s728_s21, 0 }
   0x9   : > { %p41_p3 = scmp.ne.s32.totalorder %s720_s19, %s716_s18  ;;  %p42_p4 = scmp.eq.s32.totalorder %s786_s22, 0 }
   0xa   : > { %s802_s27 = scalar_select %p26_p1, %s724_s20, %s28_s25  }
   0xb   : > { %p804_p5 = por %p36_p2, %p35_p0  ;;  %p808_p6 = por %p42_p4, %p41_p3 }
   0xc   : > { %p159_p7 = scmp.eq.s32.totalorder %s786_s22, 3  ;;  %p165_p8 = scmp.eq.s32.totalorder %s556_s23, 3 }
   0xd   : > { %p588_p9 = scmp.lt.s32.totalorder %s728_s21, 4  ;;  %s191_s7 = sand.u32 1, %s724_s20  }
   0xe   : > { %p814_p10 = por %p159_p7, %p35_p0  ;;  %p818_p11 = por %p165_p8, %p41_p3 }
   0xf   : > { %s574_s8 = sshll.u32 %s728_s21, 6  ;;  %s559_s9 = sshll.u32 %s191_s7, 6 }
  0x10   : > { %s200_s12 = scalar_lea.hbm %s938_s0, %s574_s8  ;;  %s195_s14 = scalar_lea.vmem [#allocation2], %s559_s9 }
  0x11   : > { %s201_s13 = sshll.u32 %s200_s12, 4  ;;  %s203_s15 = sshll.u32 %s195_s14, 4  ;;  %s202_s13 = int_to_ptr.hbm [resolvable:$true] %s201_s13  ;;  %s204_s15 = int_to_ptr.vmem [resolvable:$true] %s203_s15 }
  0x12   : > { %p829_p12 = pnand %p588_p9, %p804_p5  ;;  %p562_p13 = scmp.ge.s32.totalorder %s728_s21, 1 }
  0x13   : > { %p229_p0 = scmp.lt.s32.totalorder %s728_s21, 5  ;;  %s192_s17 = scalar_lea.sflag [#allocation3], %s191_s7 }
  0x14   : > { %s632_s23 = sshra.s32 %s202_s13, 4  ;;  %p636_p2 = pneg %p829_p12  ;;  %s633_s23 = int_to_ptr.hbm [resolvable:$true] %s632_s23 }
  0x15   : > { %s634_s25 = scalar_lea.hbm %s633_s23, 64  ;;  %s639_s28 = scalar_lea.hbm %s938_s0, 256 }
  0x16   : > { %p635_p1 = scmp.ne.s32.totalorder %s633_s23, %s634_s25  ;;  %p640_p5 = scmp.lt.s32.totalorder %s633_s23, %s938_s0 }
  0x17   : > { %p641_p7 = scmp.lt.s32.totalorder %s639_s28, %s634_s25 }
  0x18   : > { %p637_p3 = pnand %p636_p2, %p635_p1 }
  0x19   : > { %p642_p8 = por %p641_p7, %p640_p5 }
  0x1a   : > { %p638_p4 = pneg %p637_p3 }
  0x1c   : > { %p643_p9 = pnand %p642_p8, %p638_p4 }
  0x1e   : > { %646 = shalt.err (!%p643_p9)
}
  0x1f   : > { %s730_s7 = smov 128   ;;  %s731_s11 = smov 8  }
  0x20   : > { %583 = dma.hbm_to_vmem [thread:$0]  (!%p829_p12), %s202_s13, 1024, %s204_s15, %s192_s17, %s730_s7, %s730_s7, %s731_s11  }
  0x21   : > { %p230_p1 = pnand %p562_p13, %p229_p0 }
  0x22   : > { %s850_s12 = sand.u32 (!%p230_p1), 1, %s720_s19  }
  0x23   : > { %233 = sbr.rel (%p230_p1) target bundleno = 212 (0xd4), region = 40  ;;  %s563_s14 = sshll.u32 (!%p230_p1), %s850_s12, 6 }
  0x24   : > { %s236_s23 = scalar_lea.sflag (!%p230_p1), [#allocation3], %s850_s12  ;;  %s856_s25 = scalar_lea.vmem (!%p230_p1), [#allocation2], %s563_s14 }
  0x28   : > { %707 = dma.done.wait (%p808_p6), %s236_s23, 1024  }
  0x29   : > { %709 = vsyncadd (%p808_p6), %s236_s23, 4294966272  ;;  %s565_s13 = sshll.u32 %s786_s22, 3  ;;  %v732_v0 = vmov 0   ;;  %v630_v20 = vld [vmem:[%s940_s2] ss:$0 sm:$0xff]  ;;  %s881_s23 = scalar_lea.vmem [#allocation5], %s563_s14 }
  0x2a   : > { %629 = vset.pattern.permute.xlu2 %v732_v0  ;;  %628 = vset.pattern.permute.xlu1 %v732_v0  ;;  %p279_p12 = scmp.lt.s32.totalorder %s565_s13, 31  ;;  %v875_v21 = vld [vmem:[%s942_s4] ss:$0 sm:$0xff]  ;;  %v294_v31 = vld [vmem:[%s856_s25 + $0x18] sm:$0xff]  ;;  %v297_v40 = vld [vmem:[%s856_s25 + $0x30] sm:$0xff]  ;;  %s575_s14 = sshll.u32 %s786_s22, 6 }
  0x2b   : > { %627 = vset.pattern.permute.xlu0 %v732_v0  ;;  %v291_v24 = vld [vmem:[%s856_s25] sm:$0xff]  ;;  %v293_v45 = vld [vmem:[%s856_s25 + $0x10] sm:$0xff]  ;;  %v292_v48 = vld [vmem:[%s856_s25 + $0x8] sm:$0xff]  ;;  %s455_s16 = scalar_lea.hbm %s943_s5, %s575_s14  ;;  %s456_s17 = sshll.u32 %s881_s23, 4  ;;  %s457_s17 = int_to_ptr.vmem [resolvable:$true] %s456_s17 }
  0x2c   : > { %s954_s13 = smov (!%p279_p12, %s565_s13), 31  ;;  %v296_v59 = vld [vmem:[%s856_s25 + $0x28] sm:$0xff]  ;;  %v295_v60 = vld [vmem:[%s856_s25 + $0x20] sm:$0xff]  ;;  %s444_s22 = scalar_lea.sflag [#allocation4], %s850_s12 }
  0x2d   : > { %s566_s15 = sshll.u32 %s954_s13, 3  ;;  %s682_s9 = scalar_lea.hbm %s943_s5, 256 }
  0x2e   : > { %s282_s26 = scalar_lea.vmem %s939_s1, %s566_s15  ;;  %s288_s28 = scalar_lea.vmem %s941_s3, %s566_s15 }
  0x2f   : > { %v303_v1 = vld [vmem:[%s282_s26 + $0x20] sm:$0xff]  ;;  %v301_v2 = vld [vmem:[%s282_s26 + $0x10] sm:$0xff]  ;;  %v304_v4 = vld [vmem:[%s282_s26 + $0x28] sm:$0xff] }
  0x30   : > { %v299_v3 = vld [vmem:[%s282_s26] sm:$0xff]  ;;  %330 = vperm.xlu2 %629, %v303_v1   ;;  %320 = vperm.xlu1 %628, %v301_v2   ;;  %v302_v5 = vld [vmem:[%s282_s26 + $0x18] sm:$0xff]  ;;  %v300_v6 = vld [vmem:[%s282_s26 + $0x8] sm:$0xff] }
  0x31   : > { %310 = vperm.xlu0 %627, %v299_v3   ;;  %v359_v7 = vld [vmem:[%s288_s28] sm:$0xff]  ;;  %v306_v8 = vld [vmem:[%s282_s26 + $0x38] sm:$0xff]  ;;  %v305_v9 = vld [vmem:[%s282_s26 + $0x30] sm:$0xff]  ;;  %s458_s26 = sshll.u32 %s455_s16, 4  ;;  %s459_s26 = int_to_ptr.hbm [resolvable:$true] %s458_s26 }
  0x32   : > { %v362_v10 = vld [vmem:[%s288_s28 + $0x18] sm:$0xff]  ;;  %v361_v11 = vld [vmem:[%s288_s28 + $0x10] sm:$0xff]  ;;  %v360_v12 = vld [vmem:[%s288_s28 + $0x8] sm:$0xff]  ;;  %s676_s29 = sshra.s32 %s459_s26, 4  ;;  %s677_s29 = int_to_ptr.hbm [resolvable:$true] %s676_s29 }
  0x33   : > { %v365_v13 = vld [vmem:[%s288_s28 + $0x30] sm:$0xff]  ;;  %v364_v14 = vld [vmem:[%s288_s28 + $0x28] sm:$0xff]  ;;  %v363_v15 = vld [vmem:[%s288_s28 + $0x20] sm:$0xff]  ;;  %s678_s8 = scalar_lea.hbm %s677_s29, 64  ;;  %p683_p2 = scmp.lt.s32.totalorder %s677_s29, %s943_s5 }
  0x34   : > { %v366_v16 = vld [vmem:[%s288_s28 + $0x38] sm:$0xff]  ;;  %p679_p6 = scmp.ne.s32.totalorder %s677_s29, %s678_s8  ;;  %p684_p3 = scmp.lt.s32.totalorder %s682_s9, %s678_s8 }
  0x36   : > { %p680_p13 = pnand %p679_p6, %p814_p10  ;;  %p685_p4 = por %p684_p3, %p683_p2 }
  0x38   : > { %335 = vperm.xlu2 %629, %v304_v4   ;;  %325 = vperm.xlu1 %628, %v302_v5   ;;  %p681_p0 = pneg %p680_p13 }
  0x39   : > { %315 = vperm.xlu0 %627, %v300_v6   ;;  %v298_v6 = vld [vmem:[%s856_s25 + $0x38] sm:$0xff] }
  0x3a   : > { %p686_p5 = pnand %p685_p4, %p681_p0 }
  0x40   : > { %370 = vperm.xlu2 %629, %v359_v7   ;;  %345 = vperm.xlu1 %628, %v306_v8  }
  0x41   : > { %340 = vperm.xlu0 %627, %v305_v9  }
  0x48   : > { %385 = vperm.xlu2 %629, %v362_v10   ;;  %380 = vperm.xlu1 %628, %v361_v11  }
  0x49   : > { %375 = vperm.xlu0 %627, %v360_v12  }
  0x50   : > { %400 = vperm.xlu2 %629, %v365_v13   ;;  %395 = vperm.xlu1 %628, %v364_v14  }
  0x51   : > { %390 = vperm.xlu0 %627, %v363_v15  }
  0x59   : > { %405 = vperm.xlu0 %627, %v366_v16  }
  0x8a   : > { %v331_v17 = vpop.permute.xlu2 %330 }
  0x8b   : > { %v355_v58 = vmul.f32 %v630_v20, %v331_v17 }
  0x8d   : > { %v423_v1 = vmul.f32 %v355_v58, %v295_v60 }
  0x92   : > { %v336_v18 = vpop.permute.xlu2 %335 }
  0x93   : > { %v356_v57 = vmul.f32 %v630_v20, %v336_v18 }
  0x95   : > { %v424_v62 = vmul.f32 %v356_v57, %v296_v59 }
  0x9a   : > { %v371_v19 = vpop.permute.xlu2 %370 }
  0x9b   : > { %v411_v25 = vmul.f32 %v875_v21, %v371_v19 }
  0xa2   : > { %v321_v22 = vpop.permute.xlu1 %320  ;;  %v386_v29 = vpop.permute.xlu2 %385 }
  0xa3   : > { %v311_v23 = vpop.permute.xlu0 %310  ;;  %v414_v34 = vmul.f32 %v875_v21, %v386_v29  ;;  %v353_v44 = vmul.f32 %v630_v20, %v321_v22 }
  0xa4   : > { %v351_v26 = vmul.f32 %v630_v20, %v311_v23 }
  0xa5   : > { %v421_v50 = vmul.f32 %v353_v44, %v293_v45 }
  0xa6   : > { %v419_v27 = vmul.f32 %v351_v26, %v291_v24 }
  0xa8   : > { %v427_v28 = vadd.f32 %v419_v27, %v411_v25 }
  0xaa   : > { %435 = vst [vmem:[%s881_s23] sm:$0xff] %v427_v28  ;;  %v326_v30 = vpop.permute.xlu1 %325  ;;  %v401_v38 = vpop.permute.xlu2 %400 }
  0xab   : > { %v354_v32 = vmul.f32 %v630_v20, %v326_v30  ;;  %v316_v33 = vpop.permute.xlu0 %315  ;;  %v417_v42 = vmul.f32 %v875_v21, %v401_v38 }
  0xac   : > { %v352_v46 = vmul.f32 %v630_v20, %v316_v33 }
  0xad   : > { %v422_v35 = vmul.f32 %v354_v32, %v294_v31 }
  0xae   : > { %v420_v53 = vmul.f32 %v352_v46, %v292_v48 }
  0xaf   : > { %v430_v36 = vadd.f32 %v422_v35, %v414_v34 }
  0xb1   : > { %438 = vst [vmem:[%s881_s23 + $0x18] sm:$0xff] %v430_v36 }
  0xb2   : > { %v346_v37 = vpop.permute.xlu1 %345 }
  0xb3   : > { %v341_v39 = vpop.permute.xlu0 %340  ;;  %v358_v5 = vmul.f32 %v630_v20, %v346_v37 }
  0xb4   : > { %v357_v41 = vmul.f32 %v630_v20, %v341_v39 }
  0xb5   : > { %v426_v8 = vmul.f32 %v358_v5, %v298_v6 }
  0xb6   : > { %v425_v43 = vmul.f32 %v357_v41, %v297_v40 }
  0xb8   : > { %v433_v47 = vadd.f32 %v425_v43, %v417_v42 }
  0xba   : > { %441 = vst [vmem:[%s881_s23 + $0x30] sm:$0xff] %v433_v47  ;;  %v381_v49 = vpop.permute.xlu1 %380 }
  0xbb   : > { %v413_v51 = vmul.f32 %v875_v21, %v381_v49  ;;  %v376_v52 = vpop.permute.xlu0 %375 }
  0xbc   : > { %v412_v54 = vmul.f32 %v875_v21, %v376_v52 }
  0xbd   : > { %v429_v55 = vadd.f32 %v421_v50, %v413_v51 }
  0xbe   : > { %v428_v56 = vadd.f32 %v420_v53, %v412_v54 }
  0xbf   : > { %437 = vst [vmem:[%s881_s23 + $0x10] sm:$0xff] %v429_v55 }
  0xc0   : > { %436 = vst [vmem:[%s881_s23 + $0x8] sm:$0xff] %v428_v56 }
  0xc2   : > { %v396_v61 = vpop.permute.xlu1 %395 }
  0xc3   : > { %v416_v63 = vmul.f32 %v875_v21, %v396_v61  ;;  %v391_v0 = vpop.permute.xlu0 %390 }
  0xc4   : > { %v415_v2 = vmul.f32 %v875_v21, %v391_v0 }
  0xc5   : > { %v432_v3 = vadd.f32 %v424_v62, %v416_v63 }
  0xc6   : > { %v431_v4 = vadd.f32 %v423_v1, %v415_v2 }
  0xc7   : > { %440 = vst [vmem:[%s881_s23 + $0x28] sm:$0xff] %v432_v3 }
  0xc8   : > { %439 = vst [vmem:[%s881_s23 + $0x20] sm:$0xff] %v431_v4 }
  0xcb   : > { %v406_v7 = vpop.permute.xlu0 %405 }
  0xcc   : > { %v418_v9 = vmul.f32 %v875_v21, %v406_v7 }
  0xce   : > { %v434_v10 = vadd.f32 %v426_v8, %v418_v9 }
  0xd0   : > { %442 = vst [vmem:[%s881_s23 + $0x38] sm:$0xff] %v434_v10 }
  0xd1   : > { %689 = shalt.err (!%p686_p5)
}
  0xd2   : > { %s733_s12 = smov 128   ;;  %s734_s11 = smov 8  }
  0xd3   : > { %578 = dma.vmem_to_hbm [thread:$0]  (%p814_p10), %s457_s17, 1024, %s459_s26, %s444_s22, %s733_s12, %s733_s12, %s734_s11  }
  0xd4 PF: > { %p589_p7 = scmp.ge.s32.totalorder %s728_s21, 2  ;;  %s473_s23 = sand.u32 1, %s716_s18  }
  0xd5   : > { %s474_s14 = scalar_lea.sflag [#allocation4], %s473_s23 }
  0xd6   : > { %p585_p8 = pnand %p589_p7, %p818_p11 }
  0xd8   : > { %p586_p9 = pneg %p585_p8 }
  0xda   : > { %711 = dma.done.wait (%p586_p9), %s474_s14, 1024  }
  0xdb   : > { %713 = vsyncadd (%p586_p9), %s474_s14, 4294966272  ;;  %p18_p1 = scmp.ge.s32.totalorder %s790_s24, 6   ;;  %s949_s18 = smov %s720_s19 }
  0xdc   : > { %s950_s19 = smov %s724_s20  ;;  %s951_s20 = smov %s802_s27 }
  0xdd   : > { %s952_s21 = smov %s790_s24  ;;  %20 = sbr.rel (!%p18_p1) target bundleno = 5 (0x5), region = 91 }
  0xe2   :  { %480 = vsyncpa [#allocation3], 1 }
  0xe3   :  { %482 = vsyncpa [#allocation3 + $0x1], 1 }
  0xe4   :  { %483 = vsyncpa [#allocation4], 1 }
  0xe5   :  { %485 = vsyncpa [#allocation4 + $0x1], 1 }

</bundles_post_ra>
